<compile_context>
chip_gen: v7x
topology: tpu7x:2x2x1
jax: 0.10.0
libtpu: 0.0.40
codegen_flags: <defaults>
</compile_context>

<pallas_src>
import jax
import jax.numpy as jnp
from jax.experimental import pallas as pl
from jax.experimental.pallas import tpu as pltpu


def _conv2x2_kernel(w_ref, b_ref, x_ref, o_ref):
    """Valid 2x2 conv (stride 1, single in/out channel) over Nb whole planes.

    w_ref: SMEM f32[4]            flattened 2x2 kernel [w00, w01, w10, w11]
    b_ref: SMEM f32[1]            bias
    x_ref: VMEM f32[Nb, H,  W ]   Nb whole input planes
    o_ref: VMEM f32[Nb, Ho, Wo]   valid output window, Ho = H-1, Wo = W-1
    """
    x = x_ref[...]                      # (Nb, H, W)
    Nb, H, W = x.shape
    Ho, Wo = H - 1, W - 1

    # Scalars from SMEM, read once and broadcast against whole vregs.
    w00 = w_ref[0]
    w01 = w_ref[1]
    w10 = w_ref[2]
    w11 = w_ref[3]
    bias = b_ref[0]

    # Column taps: one masked view (no data movement) + one lane shift.
    x_l = x[:, :, :Wo]                  # x[n, r, c]
    x_r = x[:, :, 1:]                   # x[n, r, c+1]

    # Row-factored accumulation: "top" is the contribution of row r to output
    # row r, "bot" is the contribution of row r to output row r-1.  A single
    # sublane shift (bot[:, 1:, :]) replaces the two row-shifted taps.
    top = x_l * w00 + x_r * w01 + bias  # (Nb, H, Wo)
    bot = x_l * w10 + x_r * w11         # (Nb, H, Wo)

    o_ref[...] = (top[:, :Ho, :] + bot[:, 1:, :]).astype(o_ref.dtype)


def conv2d_1x1ch_2x2(x_nchw, weight, bias, *, vmem_budget_bytes=32 * 1024 * 1024):
    """Equivalent of nn.Conv2d(1, 1, (2,2), stride=1, padding=0, bias=True).

    x_nchw: (N, 1, H, W) float32
    weight: (1, 1, 2, 2) float32
    bias:   (1,) float32
    returns (N, 1, H-1, W-1) float32
    """
    N, C, H, W = x_nchw.shape
    assert C == 1, "module is defined for a single input/output channel"
    assert weight.shape == (1, 1, 2, 2)
    assert H >= 2 and W >= 2
    Ho, Wo = H - 1, W - 1

    x3 = x_nchw.reshape(N, H, W).astype(jnp.float32)   # contiguous, no copy

    # --- choose Nb = planes per grid step --------------------------------
    plane_in_bytes = H * W * 4
    plane_out_bytes = Ho * Wo * 4
    # per-plane footprint: 2x double-buffered input + 2x double-buffered output
    # + ~3 full-plane live temporaries (x_r / top / bot).
    per_plane = 2 * plane_in_bytes + 2 * plane_out_bytes + 3 * plane_in_bytes
    max_planes = max(1, vmem_budget_bytes // per_plane)

    # Keep at least 2 grid steps when N >= 2 so the "parallel" axis can shard
    # across v7x's two TensorCores (harmless on single-TC v5e/v6e).
    cap = min(max_planes, N if N < 2 else max(1, N // 2))
    Nb = 1                               # 1 always divides N -> robust fallback
    for d in range(cap, 0, -1):
        if N % d == 0:
            Nb = d
            break
    grid = (N // Nb,)

    # TODO(synk): if a single (H, W) plane ever exceeds the VMEM budget, add a
    # halo'd row-tiling path; for now we keep Nb=1 and just declare the limit.
    step_bytes = Nb * per_plane
    vmem_limit = int(max(32 * 1024 * 1024, int(1.25 * step_bytes)))
    vmem_limit = min(vmem_limit, 48 * 1024 * 1024)   # stay v7x-safe (64 MiB phys)

    w_flat = weight.reshape(4).astype(jnp.float32)
    b_flat = jnp.asarray(bias).reshape(1).astype(jnp.float32)

    out = pl.pallas_call(
        _conv2x2_kernel,
        out_shape=jax.ShapeDtypeStruct((N, Ho, Wo), jnp.float32),
        grid=grid,
        in_specs=[
            pl.BlockSpec(memory_space=pltpu.MemorySpace.SMEM),   # weights (4,)
            pl.BlockSpec(memory_space=pltpu.MemorySpace.SMEM),   # bias (1,)
            pl.BlockSpec((Nb, H, W), lambda i: (i, 0, 0)),       # whole planes
        ],
        out_specs=pl.BlockSpec((Nb, Ho, Wo), lambda i: (i, 0, 0)),  # valid window only
        compiler_params=pltpu.CompilerParams(
            dimension_semantics=("parallel",),
            vmem_limit_bytes=vmem_limit,
        ),
    )(w_flat, b_flat, x3)

    return out.reshape(N, 1, Ho, Wo)


if __name__ == "__main__":
    key = jax.random.PRNGKey(0)
    kx, kw, kb = jax.random.split(key, 3)

    # Small shapes consistent with the module: N=2, C=1 (Conv2d(1,1,...)), H=W=16.
    x = jax.random.normal(kx, (2, 1, 16, 16), dtype=jnp.float32)
    weight = jax.random.normal(kw, (1, 1, 2, 2), dtype=jnp.float32) * 0.5
    bias = jax.random.normal(kb, (1,), dtype=jnp.float32) * 0.1

    out = conv2d_1x1ch_2x2(x, weight, bias)
    out = jax.block_until_ready(out)

    # Reference: plain JAX valid 2x2 cross-correlation + bias (== torch.conv2d).
    ref = jax.lax.conv_general_dilated(
        x, weight, window_strides=(1, 1), padding="VALID",
        dimension_numbers=("NCHW", "OIHW", "NCHW")) + bias.reshape(1, 1, 1, 1)

    assert out.shape == (2, 1, 15, 15)
    assert jnp.allclose(out, ref, atol=1e-5), "mismatch vs reference conv"

    print("KERNEL_OK")
</pallas_src>

<mosaic_0001>
module attributes {stable_mosaic.version = 11 : i64} {
  func.func @_conv2x2_kernel(%arg0: i32, %arg1: memref<4xf32, #tpu.memory_space<smem>>, %arg2: memref<1xf32, #tpu.memory_space<smem>>, %arg3: memref<1x16x16xf32, #tpu.memory_space<vmem>>, %arg4: memref<1x15x15xf32, #tpu.memory_space<vmem>>) attributes {dimension_semantics = [#tpu.dimension_semantics<parallel>], iteration_bounds = array<i64: 2>, scalar_prefetch = 0 : i64, scratch_operands = 0 : i64, tpu.core_type = #tpu.core_type<tc>, window_params = [{transform_indices = @transform_0, window_bounds = array<i64: 4>}, {transform_indices = @transform_1, window_bounds = array<i64: 1>}, {transform_indices = @transform_2, window_bounds = array<i64: 1, 16, 16>}, {transform_indices = @transform_3, window_bounds = array<i64: 1, 15, 15>}]} {
    %c0 = arith.constant 0 : index
    %c0_0 = arith.constant 0 : index
    %c0_1 = arith.constant 0 : index
    %0 = vector.load %arg3[%c0, %c0_0, %c0_1] : memref<1x16x16xf32, #tpu.memory_space<vmem>>, vector<1x16x16xf32>
    %c0_2 = arith.constant 0 : index
    %1 = memref.load %arg1[%c0_2] : memref<4xf32, #tpu.memory_space<smem>>
    %c1 = arith.constant 1 : index
    %2 = memref.load %arg1[%c1] : memref<4xf32, #tpu.memory_space<smem>>
    %c2 = arith.constant 2 : index
    %3 = memref.load %arg1[%c2] : memref<4xf32, #tpu.memory_space<smem>>
    %c3 = arith.constant 3 : index
    %4 = memref.load %arg1[%c3] : memref<4xf32, #tpu.memory_space<smem>>
    %c0_3 = arith.constant 0 : index
    %5 = memref.load %arg2[%c0_3] : memref<1xf32, #tpu.memory_space<smem>>
    %6 = vector.extract_strided_slice %0 {offsets = [0, 0, 0], sizes = [1, 16, 15], strides = [1, 1, 1]} : vector<1x16x16xf32> to vector<1x16x15xf32>
    %7 = vector.extract_strided_slice %0 {offsets = [0, 0, 1], sizes = [1, 16, 15], strides = [1, 1, 1]} : vector<1x16x16xf32> to vector<1x16x15xf32>
    %8 = vector.broadcast %1 : f32 to vector<1x16x15xf32>
    %9 = arith.mulf %6, %8 : vector<1x16x15xf32>
    %10 = vector.broadcast %2 : f32 to vector<1x16x15xf32>
    %11 = arith.mulf %7, %10 : vector<1x16x15xf32>
    %12 = arith.addf %9, %11 : vector<1x16x15xf32>
    %13 = vector.broadcast %5 : f32 to vector<1x16x15xf32>
    %14 = arith.addf %12, %13 : vector<1x16x15xf32>
    %15 = vector.broadcast %3 : f32 to vector<1x16x15xf32>
    %16 = arith.mulf %6, %15 : vector<1x16x15xf32>
    %17 = vector.broadcast %4 : f32 to vector<1x16x15xf32>
    %18 = arith.mulf %7, %17 : vector<1x16x15xf32>
    %19 = arith.addf %16, %18 : vector<1x16x15xf32>
    %20 = vector.extract_strided_slice %14 {offsets = [0, 0, 0], sizes = [1, 15, 15], strides = [1, 1, 1]} : vector<1x16x15xf32> to vector<1x15x15xf32>
    %21 = vector.extract_strided_slice %19 {offsets = [0, 1, 0], sizes = [1, 15, 15], strides = [1, 1, 1]} : vector<1x16x15xf32> to vector<1x15x15xf32>
    %22 = arith.addf %20, %21 : vector<1x15x15xf32>
    %c0_4 = arith.constant 0 : index
    %c0_5 = arith.constant 0 : index
    %c0_6 = arith.constant 0 : index
    %23 = vector.load %arg4[%c0_4, %c0_5, %c0_6] : memref<1x15x15xf32, #tpu.memory_space<vmem>>, vector<1x15x15xf32>
    tpu.vector_store %arg4[%c0_4, %c0_5, %c0_6], %22 {strides = array<i32>} : memref<1x15x15xf32, #tpu.memory_space<vmem>>, vector<1x15x15xf32>,
    return
  }
  func.func @transform_0(%arg0: i32) -> i32 {
    %c0_i32 = arith.constant 0 : i32
    %c0_i32_0 = arith.constant 0 : i32
    return %c0_i32 : i32
  }
  func.func @transform_1(%arg0: i32) -> i32 {
    %c0_i32 = arith.constant 0 : i32
    %c0_i32_0 = arith.constant 0 : i32
    return %c0_i32 : i32
  }
  func.func @transform_2(%arg0: i32) -> (i32, i32, i32) {
    %c0_i32 = arith.constant 0 : i32
    %c0_i32_0 = arith.constant 0 : i32
    %c0_i32_1 = arith.constant 0 : i32
    return %arg0, %c0_i32, %c0_i32_0 : i32, i32, i32
  }
  func.func @transform_3(%arg0: i32) -> (i32, i32, i32) {
    %c0_i32 = arith.constant 0 : i32
    %c0_i32_0 = arith.constant 0 : i32
    %c0_i32_1 = arith.constant 0 : i32
    return %arg0, %c0_i32, %c0_i32_0 : i32, i32, i32
  }
}

</mosaic_0001>

<bundles_post_ra>
// kernel: tpu_custom_call.1
= control target key start
LH: loop header
LB: loop body
LE: loop exit
PB: predicated region body
PF: predicated region fallthrough
CT: control target
= control target key end

     0   :  { %s659_s0 = inlined_call_operand.vmem [shape: f32[4], index: 0, kind: input, shape index: {}]   ;;  %s660_s1 = inlined_call_operand.<no memory space> [shape: f32[1], index: 1, kind: input, shape index: {}]   ;;  %s661_s2 = inlined_call_operand.hbm [shape: f32[2,16,16], index: 2, kind: input, shape index: {}]   ;;  %s662_s3 = inlined_call_operand.vmem [shape: f32[2,15,15], index: 3, kind: output, shape index: {}]  }
   0x1   :  { %8 = sst [smem:[#allocation2]] %s660_s1 }
   0x2   :  { %9 = vsyncpa [#allocation5], 0 }
   0x3   :  { %10 = vsyncpa [#allocation4], 0 }
   0x4   :  { %12 = vsyncpa [#allocation4 + $0x1], 0  ;;  %s526_s14 = smov 0   ;;  %s528_s15 = smov 0  }
   0x5   :  { %s530_s16 = smov 0   ;;  %s532_s17 = smov 0  }
   0x6 LB: > { %s545_s1 = sadd.s32 4294967295, %s496_s17   ;;  %s548_s18 = sadd.s32 1, %s496_s17   ;;  %s496_s17 = sphi %s532_s17, %s674_s17   ;;  %s492_s16 = sphi %s530_s16, %s673_s16   ;;  %s488_s15 = sphi %s528_s15, %s672_s15   ;;  %s484_s14 = sphi %s526_s14, %s671_s14  }
   0x7   : > { %s64_s19 = ssub.s32 %s496_s17, %s548_s18  ;;  %s67_s20 = sadd.s32 1, %s492_s16 }
   0x8   : > { %p65_p0 = scmp.eq.s32.totalorder %s64_s19, 0  ;;  %p74_p1 = scmp.ne.s32.totalorder %s492_s16, %s488_s15 }
   0x9   : > { %p75_p2 = scmp.eq.s32.totalorder %s496_s17, 0  ;;  %p80_p3 = scmp.ne.s32.totalorder %s488_s15, %s484_s14 }
   0xa   : > { %s558_s21 = scalar_select %p65_p0, %s492_s16, %s67_s20  }
   0xb   : > { %p76_p4 = por %p75_p2, %p74_p1  ;;  %p81_p5 = scmp.eq.s32.totalorder %s545_s1, 0 }
   0xc   : > { %p342_p6 = scmp.ge.s32.totalorder %s496_s17, 1  ;;  %p117_p7 = scmp.lt.s32.totalorder %s496_s17, 3 }
   0xd   : > { %p565_p8 = por %p81_p5, %p80_p3  ;;  %s130_s26 = sshll.u32 %s659_s0, 4  ;;  %s131_s26 = int_to_ptr.vmem [resolvable:$true] %s130_s26 }
   0xe   : > { %p569_p9 = pnand %p342_p6, %p117_p7  ;;  %p375_p11 = scmp.lt.s32.totalorder %s496_s17, 2 }
   0xf   : > { %s665_s22 = scalar_select %p565_p8, 1, 0 }
  0x10   : > { %s666_s23 = scalar_select %p569_p9, 1, 0 }
  0x11   : > { %p366_p10 = pneg %p569_p9  ;;  %s144_s27 = sand.u32 1, %s492_s16  }
  0x12   : > { %p586_p13 = pnand %p375_p11, %p76_p4  ;;  %s345_s30 = sshll.u32 %s144_s27, 4 }
  0x13   : > { %p582_p12 = pnand %p366_p10, %p81_p5  ;;  %s413_s4 = scalar_lea.vmem %s131_s26, 16 }
  0x14   : > { %p414_p0 = scmp.ne.s32.totalorder %s131_s26, %s413_s4  ;;  %p421_p6 = scmp.lt.s32.totalorder %s131_s26, %s131_s26 }
  0x15   : > { %p415_p1 = pneg %p582_p12  ;;  %p422_p7 = scmp.lt.s32.totalorder %s413_s4, %s413_s4 }
  0x17   : > { %p416_p2 = pnand %p415_p1, %p414_p0  ;;  %p423_p8 = por %p422_p7, %p421_p6 }
  0x19   : > { %p417_p3 = pneg %p416_p2 }
  0x1b   : > { %p424_p9 = pnand %p423_p8, %p417_p3 }
  0x1d   : > { %427 = shalt.err (!%p424_p9)
}
  0x1e   : > { %s498_s5 = smov [#allocation3]   ;;  %s358_s6 = sshll.u32 %s496_s17, 8 }
  0x1f   : > { %369 = dma.vmem_to_smem (!%p582_p12), %s131_s26, 16, %s498_s5, [#allocation5]  }
  0x20   : > { %s598_s9 = scalar_lea.hbm %s661_s2, %s358_s6  ;;  %s148_s10 = scalar_lea.vmem [#allocation6], %s345_s30 }
  0x21   : > { %s155_s11 = sshll.u32 %s148_s10, 4  ;;  %s602_s12 = scalar_lea.sflag [#allocation4], %s144_s27  ;;  %s600_s11 = int_to_ptr.vmem [resolvable:$true] %s155_s11 }
  0x22   : > { %s428_s13 = scalar_lea.hbm %s598_s9, 256  ;;  %p430_p8 = pneg %p586_p13 }
  0x23   : > { %p429_p4 = scmp.ne.s32.totalorder %s598_s9, %s428_s13  ;;  %s433_s19 = scalar_lea.hbm %s661_s2, 512 }
  0x24   : > { %p434_p11 = scmp.lt.u32.totalorder %s598_s9, %s661_s2  ;;  %p435_p12 = scmp.lt.u32.totalorder %s433_s19, %s428_s13 }
  0x25   : > { %p431_p9 = pnand %p430_p8, %p429_p4  ;;  %p437_p1 = scmp.lt.u32.totalorder %s428_s13, %s598_s9 }
  0x26   : > { %p436_p0 = por %p435_p12, %p434_p11 }
  0x27   : > { %p432_p10 = pneg %p431_p9 }
  0x28   : > { %p438_p2 = por %p437_p1, %p436_p0 }
  0x2a   : > { %p439_p3 = pnand %p438_p2, %p432_p10 }
  0x2c   : > { %442 = shalt.err (!%p439_p3)
}
  0x2d   : > { %s443_s25 = scalar_lea.vmem %s600_s11, 256  ;;  %s499_s26 = smov [#allocation6]  }
  0x2e   : > { %p444_p6 = scmp.ne.s32.totalorder %s600_s11, %s443_s25  ;;  %s448_s27 = sshll.u32 %s499_s26, 4  ;;  %s449_s27 = int_to_ptr.vmem [resolvable:$false] %s448_s27 }
  0x2f   : > { %s450_s28 = scalar_lea.vmem %s449_s27, 512  ;;  %p451_p9 = scmp.lt.s32.totalorder %s600_s11, %s449_s27 }
  0x30   : > { %p446_p7 = pnand %p444_p6, %p430_p8  ;;  %p452_p11 = scmp.lt.s32.totalorder %s450_s28, %s443_s25 }
  0x32   : > { %p447_p4 = pneg %p446_p7  ;;  %p453_p12 = por %p452_p11, %p451_p9 }
  0x34   : > { %p454_p0 = pnand %p453_p12, %p447_p4 }
  0x36   : > { %457 = shalt.err (!%p454_p0)
}
  0x37   : > { %s500_s30 = smov 128   ;;  %s501_s4 = smov 8  }
  0x38   : > { %373 = dma.hbm_to_vmem [thread:$0]  (!%p586_p13), %s598_s9, 256, %s600_s11, %s602_s12, %s500_s30, %s500_s30, %s501_s4  }
  0x39   : > { %p669_p8 = scmp.ne.s32.totalorder %s666_s23, 0 }
  0x3b   : > { %167 = sbr.rel (%p669_p8) target bundleno = 209 (0xd1), region = 32 }
  0x42   : > { %475 = dma.done.wait (%p81_p5), [#allocation5], 16  }
  0x43   : > { %477 = vsyncadd (%p81_p5), [#allocation5], 4294967280  ;;  %s173_s5 = sand.u32 1, %s488_s15   ;;  %p670_p10 = scmp.ne.s32.totalorder %s665_s22, 0 }
  0x44   : > { %s350_s6 = sshll.u32 %s173_s5, 4  ;;  %s174_s7 = scalar_lea.sflag [#allocation4], %s173_s5 }
  0x45   : > { %s177_s8 = scalar_lea.vmem [#allocation6], %s350_s6 }
  0x46   : > { %479 = dma.done.wait (%p670_p10), %s174_s7, 256  }
  0x47   : > { %481 = vsyncadd (%p670_p10), %s174_s7, 4294967040 }
  0x48   : > { %182 = sfence }
  0x49   : > { %s355_s23 = sld [smem:[#allocation3 + $0x3]]  ;;  %s353_s29 = sld [smem:[#allocation3 + $0x1]]  ;;  %v206_v0 = vld [vmem:[%s177_s8] sm:$0xff]  ;;  %v207_v1 = vld [vmem:[%s177_s8 + $0x8] sm:$0xff]  ;;  %vm250_vm0 = vcmask 1046528   ;;  %vm258_vm1 = vcmask 121856  }
  0x4a   : > { %s502_s9 = smov 127   ;;  %s354_s22 = sld [smem:[#allocation3 + $0x2]]  ;;  %vm260_vm2 = vcmask 120832  }
  0x4b   : > { %s208_s10 = sld [smem:[#allocation3]]  ;;  %p201_p5 = scmp.lt.s32.totalorder %s545_s1, 1 }
  0x4c   : > { %s212_s11 = sld [smem:[#allocation2]] }
  0x4d   : > { %s676_s1 = smov (!%p201_p5, %s545_s1), 1 }
  0x4e   : > { %s359_s12 = sshll.u32 %s676_s1, 4 }
  0x4f   : > { %v235_v2 = vstv %s355_s23  ;;  %v216_v4 = vstv %s353_s29  ;;  %s205_s17 = scalar_lea.vmem %s662_s3, %s359_s12 }
  0x50   : > { %v236_v3 = vmul.f32 %v235_v2, %v206_v0  ;;  %v217_v5 = vmul.f32 %v216_v4, %v206_v0  ;;  %v237_v6 = vmul.f32 %v235_v2, %v207_v1  ;;  %v218_v7 = vmul.f32 %v216_v4, %v207_v1 }
  0x51   : > { %v232_v8 = vstv %s354_s22  ;;  %v213_v9 = vstv %s208_s10 }
  0x52   : > { %240 = vrot.lane.b32.xlu0 %v236_v3, %s502_s9  ;;  %221 = vrot.lane.b32.xlu1 %v217_v5, %s502_s9  ;;  %v233_v10 = vmul.f32 %v232_v8, %v206_v0  ;;  %v214_v12 = vmul.f32 %v213_v9, %v206_v0  ;;  %v234_v14 = vmul.f32 %v232_v8, %v207_v1  ;;  %v229_v19 = vstv %s212_s11 }
  0x53   : > { %v215_v15 = vmul.f32 %v213_v9, %v207_v1 }
  0x56   : > { %242 = vrot.lane.b32.xlu0 %v237_v6, %s502_s9  ;;  %223 = vrot.lane.b32.xlu1 %v218_v7, %s502_s9 }
  0xc4   : > { %v241_v11 = vpop.permute.xlu0 %240  ;;  %v222_v13 = vpop.permute.xlu1 %221 }
  0xc5   : > { %v246_v16 = vadd.f32 %v241_v11, %v233_v10  ;;  %v227_v17 = vadd.f32 %v222_v13, %v214_v12 }
  0xc7   : > { %v251_v23 = vrot.slane %v246_v16, 1  ;;  %v230_v25 = vadd.f32 %v229_v19, %v227_v17 }
  0xc8   : > { %v243_v18 = vpop.permute.xlu0 %242  ;;  %v224_v21 = vpop.permute.xlu1 %223 }
  0xc9   : > { %v247_v20 = vadd.f32 %v243_v18, %v234_v14  ;;  %v228_v22 = vadd.f32 %v224_v21, %v215_v15 }
  0xcb   : > { %v252_v24 = vrot.slane %v247_v20, 1  ;;  %v231_v26 = vadd.f32 %v229_v19, %v228_v22 }
  0xcd   : > { %v253_v27 = vsel %vm250_vm0, %v251_v23, %v252_v24  ;;  %v257_v29 = vadd.f32 %v252_v24, %v231_v26 }
  0xce   : > { %v256_v28 = vadd.f32 %v253_v27, %v230_v25 }
  0xcf   : > { %261 = vst.msk [vmem:[%s205_s17 + $0x8] sm:$0x7f] %vm260_vm2, %v257_v29 }
  0xd0   : > { %259 = vst.msk [vmem:[%s205_s17] sm:$0xff] %vm258_vm1, %v256_v28 }
  0xd1 PF: > { %p15_p13 = scmp.ge.s32.totalorder %s548_s18, 4   ;;  %s671_s14 = smov %s488_s15 }
  0xd2   : > { %s672_s15 = smov %s492_s16  ;;  %s673_s16 = smov %s558_s21 }
  0xd3   : > { %s674_s17 = smov %s548_s18  ;;  %17 = sbr.rel (!%p15_p13) target bundleno = 6 (0x6), region = 77 }
  0xda   :  { %283 = vsyncpa [#allocation4], 1 }
  0xdb   :  { %285 = vsyncpa [#allocation4 + $0x1], 1 }
  0xdc   :  { %286 = vsyncpa [#allocation5], 1 }
  0xdd   :  { %288 = vsyncpa [#allocation5 + $0x1], 1 }

</bundles_post_ra>
